<compile_context>
chip_gen: v7x
topology: tpu7x:2x2x1
jax: 0.10.0
libtpu: 0.0.40
codegen_flags: <defaults>
</compile_context>

<pallas_src>
import functools

import jax
import jax.numpy as jnp
from jax import lax
from jax.experimental import pallas as pl
from jax.experimental.pallas import tpu as pltpu


# ---------------------------------------------------------------------------
# Generic "FunctionalModule" Pallas wrapper
# ---------------------------------------------------------------------------
class PallasFunctionalModule:
    """Pallas analogue of hidet's FunctionalModule: wraps a functional op.

    The wrapped op must be an elementwise jnp-composable function taking one
    or more same-shape arrays (plus optional static kwargs).  The op is traced
    into the Pallas kernel body so the hot path runs on-chip over VMEM tiles.
    """

    _LANE = 128  # vreg lane width

    def __init__(self, op, *, compute_dtype=None):
        # compute_dtype=None -> torch-parity: sub-32-bit floats upcast to f32.
        # compute_dtype=jnp.bfloat16 -> bf16 fast path (v6e/v7x only; do NOT
        # use on v5e, which has no bf16 VPU/EUP).
        self.op = op
        self.compute_dtype = compute_dtype

    # ---- kernel body ------------------------------------------------------
    def _kernel(self, *refs, n_inputs, out_dtype, compute_dtype, **kwargs):
        in_refs = refs[:n_inputs]
        out_ref = refs[n_inputs]
        vals = []
        for r in in_refs:
            v = r[...]
            if compute_dtype is not None and v.dtype != compute_dtype:
                v = v.astype(compute_dtype)
            vals.append(v)
        out_ref[...] = self.op(*vals, **kwargs).astype(out_dtype)

    # ---- helpers -----------------------------------------------------------
    @staticmethod
    def _sublane_pack(dtype):
        # Sub-32-bit dtypes pack along sublanes: keep tile rows a multiple of
        # the pack factor so packed vregs stay full.
        return {4: 8, 2: 16, 1: 32}.get(jnp.dtype(dtype).itemsize, 8)

    @staticmethod
    def _vmem_budget():
        """(total working-set budget, vmem_limit_bytes), generation-aware."""
        vmem_cap = None
        try:
            info = pltpu.get_tpu_info()
            vmem_cap = getattr(info, "vmem_capacity_bytes", None)
        except Exception:
            vmem_cap = None
        if vmem_cap is None or vmem_cap <= 64 * 1024 * 1024:
            # v7x-class (64 MiB VMEM / TC) or unknown: keep the working set
            # small and rely on >= 2 parallel grid steps for throughput.
            return 12 * 1024 * 1024, 32 * 1024 * 1024
        # v5e / v6e (128 MiB VMEM): modest tile bump is a small tail win.
        return 32 * 1024 * 1024, 56 * 1024 * 1024

    @classmethod
    def _pick_layout(cls, total, pack):
        """Return (rows, cols, pad_elems) for the flat buffer.

        Preference order:
          1. lane-dense cols (multiple of 128) dividing `total` exactly, the
             widest that still keeps rows >= pack;
          2. tiny arrays: a single (1, total) row;
          3. any exact divisor in [128, 1024] (block covers full cols, so the
             128-divisibility rule does not apply) -> still no pad/slice;
          4. last resort: pad to whole (pack, 128) tiles.
        """
        best = None
        for cols in (1024, 512, 256, 128):
            if total % cols == 0:
                rows = total // cols
                if rows >= pack:
                    return rows, cols, 0
                if best is None:
                    best = (rows, cols, 0)
        if best is not None:
            return best
        if total <= 1024:
            return 1, total, 0
        for cols in range(1024, cls._LANE - 1, -1):
            if total % cols == 0:
                return total // cols, cols, 0
        # TODO(synk): pathological element counts (e.g. large primes) still
        # take a padded HBM pass; handle in-kernel with masked stores instead.
        cols = cls._LANE
        tile = cols * pack
        padded = -(-total // tile) * tile
        return padded // cols, cols, padded - total

    # ---- call --------------------------------------------------------------
    def __call__(self, *args, **kwargs):
        if not args:
            raise ValueError("need at least one array argument")
        shape = args[0].shape
        dtype = args[0].dtype
        for a in args:
            assert a.shape == shape and a.dtype == dtype, (
                "all array args must share shape/dtype")

        total = 1
        for d in shape:
            total *= d

        pack = self._sublane_pack(dtype)
        rows, cols, pad = self._pick_layout(total, pack)

        def to_2d(a):
            flat = a.reshape(-1)
            if pad:
                flat = jnp.pad(flat, (0, pad))
            return flat.reshape(rows, cols)

        args_2d = [to_2d(a) for a in args]

        # Resolve compute dtype: torch-parity default upcasts sub-32-bit
        # floats to f32 (free in a mem-bound kernel).
        compute_dtype = self.compute_dtype
        if compute_dtype is None and dtype in (jnp.bfloat16, jnp.float16):
            compute_dtype = jnp.float32

        budget, vmem_limit = self._vmem_budget()
        itemsize = jnp.dtype(dtype).itemsize
        n_buffers = (len(args) + 1) * 2  # double-buffered inputs + output
        per_buffer = budget // n_buffers
        max_tile_rows = max(
            pack, (per_buffer // (cols * itemsize)) // pack * pack)

        # Guarantee >= 2 parallel grid steps whenever there is enough work so
        # both TensorCores get a block on v7x (megacore sharding via
        # dimension_semantics=("parallel",)).  Per-step overhead ~0.35 us, so
        # this is essentially free on single-core chips too.
        num_cores = 2
        if rows >= num_cores * pack:
            per_core = -(-rows // num_cores)            # ceil(rows / cores)
            per_core = -(-per_core // pack) * pack      # round up to pack
            max_tile_rows = min(max_tile_rows, per_core)

        if rows <= max_tile_rows:
            tile_rows = rows  # single block == full array dims
        else:
            # Prefer a divisor of rows near the budget so the trailing grid
            # step is not a tiny partial block (masked stores, short DMA).
            tile_rows = max_tile_rows
            lo = max(pack, (max_tile_rows // 2) // pack * pack)
            for cand in range(max_tile_rows, lo - 1, -pack):
                if rows % cand == 0:
                    tile_rows = cand
                    break

        grid = (pl.cdiv(rows, tile_rows),)
        block = pl.BlockSpec((tile_rows, cols), lambda i: (i, 0))
        kernel = functools.partial(
            self._kernel, n_inputs=len(args), out_dtype=dtype,
            compute_dtype=compute_dtype, **kwargs)

        out_2d = pl.pallas_call(
            kernel,
            out_shape=jax.ShapeDtypeStruct((rows, cols), dtype),
            grid_spec=pltpu.PrefetchScalarGridSpec(
                num_scalar_prefetch=0,
                grid=grid,
                in_specs=[block] * len(args),
                out_specs=block,
            ),
            compiler_params=pltpu.CompilerParams(
                dimension_semantics=("parallel",),
                vmem_limit_bytes=vmem_limit,
            ),
        )(*args_2d)

        if pad:
            return out_2d.reshape(-1)[:total].reshape(shape)
        return out_2d.reshape(shape)


# ---------------------------------------------------------------------------
# Concrete ops.
# ---------------------------------------------------------------------------
def gelu_exact(x):
    # torch.nn.functional.gelu default (erf form) -- exact torch parity.
    inv_sqrt2 = jnp.asarray(0.7071067811865476, dtype=x.dtype)
    return x * 0.5 * (1.0 + lax.erf(x * inv_sqrt2))


def gelu_tanh(x):
    # tanh-approximate gelu: the transcendental runs in the EUP slot instead
    # of a long VALU erf polynomial -- keeps the kernel HBM-bound on v6e/v7x.
    # Matches torch gelu(approximate="tanh"), not the erf default.
    return jax.nn.gelu(x, approximate=True)


if __name__ == "__main__":
    key = jax.random.PRNGKey(0)
    # Small NCHW input consistent with a typical conv-ish test tensor.
    x = jax.random.normal(key, (2, 4, 16, 16), dtype=jnp.float32)

    # Exact (erf) gelu: matches torch.nn.functional.gelu default.
    module = PallasFunctionalModule(gelu_exact)
    y = jax.block_until_ready(module(x))
    assert y.shape == x.shape and y.dtype == x.dtype
    y_ref = jax.nn.gelu(x, approximate=False)
    assert jnp.allclose(y, y_ref, atol=1e-5, rtol=1e-5)

    # EUP-routed tanh-approximate gelu (perf flag for v6e / v7x).
    module_tanh = PallasFunctionalModule(gelu_tanh)
    y_tanh = jax.block_until_ready(module_tanh(x))
    assert jnp.allclose(y_tanh, jax.nn.gelu(x, approximate=True),
                        atol=1e-5, rtol=1e-5)

    # Multi-block path: enough rows that the grid splits into >= 2 parallel
    # steps (dual-TensorCore coverage on v7x).
    x_big = jax.random.normal(jax.random.PRNGKey(1), (4, 4, 32, 32),
                              dtype=jnp.float32)
    y_big = jax.block_until_ready(module(x_big))
    assert jnp.allclose(y_big, jax.nn.gelu(x_big, approximate=False),
                        atol=1e-5, rtol=1e-5)

    # Ragged (non-128-divisible) element count: handled with an exact-divisor
    # layout, i.e. no jnp.pad / post-slice HBM passes.
    x_rag = jax.random.normal(jax.random.PRNGKey(2), (2, 4, 15, 15),
                              dtype=jnp.float32)
    y_rag = jax.block_until_ready(module(x_rag))
    assert jnp.allclose(y_rag, jax.nn.gelu(x_rag, approximate=False),
                        atol=1e-5, rtol=1e-5)

    print("KERNEL_OK")
</pallas_src>

<mosaic_0001>
module attributes {stable_mosaic.version = 11 : i64} {
  func.func @_kernel(%arg0: i32, %arg1: memref<8x256xf32, #tpu.memory_space<vmem>>, %arg2: memref<8x256xf32, #tpu.memory_space<vmem>>) attributes {dimension_semantics = [#tpu.dimension_semantics<parallel>], iteration_bounds = array<i64: 1>, scalar_prefetch = 0 : i64, scratch_operands = 0 : i64, tpu.core_type = #tpu.core_type<tc>, window_params = [{transform_indices = @transform_0, window_bounds = array<i64: 8, 256>}, {transform_indices = @transform_1, window_bounds = array<i64: 8, 256>}]} {
    %c0 = arith.constant 0 : index
    %c0_0 = arith.constant 0 : index
    %0 = vector.load %arg1[%c0, %c0_0] : memref<8x256xf32, #tpu.memory_space<vmem>>, vector<8x256xf32>
    %cst = arith.constant 5.000000e-01 : f32
    %1 = vector.broadcast %cst : f32 to vector<8x256xf32>
    %2 = arith.mulf %0, %1 : vector<8x256xf32>
    %cst_1 = arith.constant 0.707106769 : f32
    %3 = vector.broadcast %cst_1 : f32 to vector<8x256xf32>
    %4 = arith.mulf %0, %3 : vector<8x256xf32>
    %5 = math.erf %4 : vector<8x256xf32>
    %cst_2 = arith.constant 1.000000e+00 : f32
    %6 = vector.broadcast %cst_2 : f32 to vector<8x256xf32>
    %7 = arith.addf %6, %5 : vector<8x256xf32>
    %8 = arith.mulf %2, %7 : vector<8x256xf32>
    %c0_3 = arith.constant 0 : index
    %c0_4 = arith.constant 0 : index
    %9 = vector.load %arg2[%c0_3, %c0_4] : memref<8x256xf32, #tpu.memory_space<vmem>>, vector<8x256xf32>
    tpu.vector_store %arg2[%c0_3, %c0_4], %8 {strides = array<i32>} : memref<8x256xf32, #tpu.memory_space<vmem>>, vector<8x256xf32>,
    return
  }
  func.func @transform_0(%arg0: i32) -> (i32, i32) {
    %c0_i32 = arith.constant 0 : i32
    %c0_i32_0 = arith.constant 0 : i32
    return %arg0, %c0_i32 : i32, i32
  }
  func.func @transform_1(%arg0: i32) -> (i32, i32) {
    %c0_i32 = arith.constant 0 : i32
    %c0_i32_0 = arith.constant 0 : i32
    return %arg0, %c0_i32 : i32, i32
  }
}

</mosaic_0001>

<bundles_post_ra>
// kernel: tpu_custom_call.1
= control target key start
LH: loop header
LB: loop body
LE: loop exit
PB: predicated region body
PF: predicated region fallthrough
CT: control target
= control target key end

     0   :  { %6 = vsyncpa [#allocation3], 0  ;;  %s140_s0 = inlined_call_operand.hbm [shape: f32[8,256], index: 0, kind: input, shape index: {}]   ;;  %s141_s1 = inlined_call_operand.hbm [shape: f32[8,256], index: 1, kind: output, shape index: {}]  }
   0x1   :  { %7 = vsyncpa [#allocation4], 0  ;;  %s104_s6 = smov [#allocation2]   ;;  %s56_s10 = scalar_lea.hbm %s140_s0, 256 }
   0x2   :  { %s14_s7 = sshll.u32 %s104_s6, 4  ;;  %p57_p0 = scmp.ne.s32.totalorder %s140_s0, %s56_s10  ;;  %s15_s7 = int_to_ptr.vmem [resolvable:$true] %s14_s7 }
   0x3   :  { %p60_p1 = scmp.lt.u32.totalorder %s56_s10, %s140_s0 }
   0x5   :  { %p62_p2 = pnand %p60_p1, %p57_p0 }
   0x7   :  { %65 = shalt.err (!%p62_p2)
}
   0x8   :  { %s66_s15 = scalar_lea.vmem %s15_s7, 256  ;;  %p71_p4 = scmp.lt.s32.totalorder %s15_s7, %s15_s7 }
   0x9   :  { %p67_p3 = scmp.ne.s32.totalorder %s15_s7, %s66_s15  ;;  %p72_p5 = scmp.lt.s32.totalorder %s66_s15, %s66_s15 }
   0xb   :  { %p73_p6 = por %p72_p5, %p71_p4 }
   0xd   :  { %p74_p7 = pnand %p73_p6, %p67_p3 }
   0xf   :  { %77 = shalt.err (!%p74_p7)
}
  0x10   :  { %17 = dma.hbm_to_vmem [thread:$0]  %s140_s0, 256, %s15_s7, [#allocation3]  }
  0x11   :  { %100 = dma.done.wait [#allocation3], 256  }
  0x12   :  { %101 = vsyncadd [#allocation3], 4294967040  ;;  %v21_v0 = vld [vmem:[#allocation2] sm:$0xff]  ;;  %v22_v1 = vld [vmem:[#allocation2 + $0x8] sm:$0xff]  ;;  %s105_s18 = smov [#allocation5]  }
  0x13   :  { %v25_v2 = vmul.f32 0.70710677, %v21_v0  ;;  %v26_v3 = vmul.f32 0.70710677, %v22_v1  ;;  %v23_v4 = vmul.f32 0.5, %v21_v0  ;;  %v24_v6 = vmul.f32 0.5, %v22_v1 }
  0x14   :  { %s41_s19 = sshll.u32 %s105_s18, 4  ;;  %s42_s19 = int_to_ptr.vmem [resolvable:$true] %s41_s19 }
  0x15   :  { %52 = verf.f32 %v25_v2  ;;  %s78_s0 = scalar_lea.vmem %s42_s19, 256  ;;  %p83_p9 = scmp.lt.s32.totalorder %s42_s19, %s42_s19 }
  0x16   :  { %54 = verf.f32 %v26_v3  ;;  %p79_p8 = scmp.ne.s32.totalorder %s42_s19, %s78_s0  ;;  %p84_p10 = scmp.lt.s32.totalorder %s78_s0, %s78_s0 }
  0x18   :  { %p85_p11 = por %p84_p10, %p83_p9 }
  0x1a   :  { %p86_p12 = pnand %p85_p11, %p79_p8 }
  0x1f   :  { %v53_v5 = vpop.eup %52 }
  0x20   :  { %v55_v7 = vpop.eup %54  ;;  %v29_v8 = vadd.f32 1.0, %v53_v5 }
  0x21   :  { %v30_v9 = vadd.f32 1.0, %v55_v7 }
  0x22   :  { %v31_v10 = vmul.f32 %v29_v8, %v23_v4 }
  0x23   :  { %v32_v11 = vmul.f32 %v30_v9, %v24_v6 }
  0x24   :  { %33 = vst [vmem:[#allocation5] sm:$0xff] %v31_v10 }
  0x25   :  { %34 = vst [vmem:[#allocation5 + $0x8] sm:$0xff] %v32_v11 }
  0x26   :  { %89 = shalt.err (!%p86_p12)
}
  0x27   :  { %s90_s22 = scalar_lea.hbm %s141_s1, 256 }
  0x28   :  { %p91_p13 = scmp.ne.s32.totalorder %s141_s1, %s90_s22  ;;  %p94_p0 = scmp.lt.u32.totalorder %s90_s22, %s141_s1 }
  0x2a   :  { %p96_p1 = pnand %p94_p0, %p91_p13 }
  0x2c   :  { %99 = shalt.err (!%p96_p1)
}
  0x2d   :  { %44 = dma.vmem_to_hbm [thread:$0]  %s42_s19, 256, %s141_s1, [#allocation4]  }
  0x2e   :  { %102 = dma.done.wait [#allocation4], 256  }
  0x2f   :  { %103 = vsyncadd [#allocation4], 4294967040 }
  0x30   :  { %48 = vsyncpa [#allocation3], 1 }
  0x31   :  { %49 = vsyncpa [#allocation4], 1 }

</bundles_post_ra>
